<compile_context>
chip_gen: v6e
topology: v6e:2x2x1
jax: 0.10.0
libtpu: 0.0.40
codegen_flags: <defaults>
</compile_context>

<pallas_src>
import functools

import jax
import jax.numpy as jnp
from jax.experimental import pallas as pl
from jax.experimental.pallas import tpu as pltpu

H1_RAW, H2_RAW = 400, 300   # torch hidden sizes
H1_PAD, H2_PAD = 512, 384   # lane/MXU-friendly padded sizes


def _round_up(x, m):
    return ((x + m - 1) // m) * m


def _critic_kernel(x_ref, a_ref, w1_ref, b1_ref, w2_ref, b2_ref,
                   w3_ref, b3_ref, out_ref):
    # ---- Layer 1: ReLU(x @ W1 + b1); padded lanes (>= 400) come out exactly 0. ----
    h1 = jnp.dot(x_ref[...], w1_ref[...], preferred_element_type=jnp.float32)
    h1 = jnp.maximum(h1 + b1_ref[...], 0.0)
    # Fold the action in: a_ref already holds the action values at lanes
    # [400, 400+act_size) and zeros elsewhere, so this reproduces
    # cat([ReLU(obs_net(x)), a], dim=1) without an in-kernel concatenation.
    h1 = (h1 + a_ref[...]).astype(jnp.bfloat16)

    # ---- Layer 2: ReLU(h1 @ W2 + b2) with a single combined (512, 384) weight. ----
    h2 = jnp.dot(h1, w2_ref[...], preferred_element_type=jnp.float32)
    h2 = jnp.maximum(h2 + b2_ref[...], 0.0).astype(jnp.bfloat16)

    # ---- Layer 3: h2 @ W3 + b3 (lane-dense 128-wide padded output). ----
    q = jnp.dot(h2, w3_ref[...], preferred_element_type=jnp.float32)
    out_ref[...] = (q + b3_ref[...]).astype(out_ref.dtype)


@functools.partial(jax.jit, static_argnames=("n_atoms", "block_b"))
def d4pg_critic_forward(x, a, params_p, *, n_atoms, block_b=512):
    """x: (B, obs_size) f32, a: (B, act_size) f32 -> (B, n_atoms) f32."""
    B, obs_size = x.shape
    act_size = a.shape[1]
    w1p, b1p, w2p, b2p, w3p, b3p = (
        params_p["w1"], params_p["b1"], params_p["w2"],
        params_p["b2"], params_p["w3"], params_p["b3"])
    OBS_P = w1p.shape[0]
    OUT_P = w3p.shape[1]

    # Batch tiling: TB multiple of 8 sublanes, pad B up to a multiple of TB.
    B8 = _round_up(B, 8)
    tb = min(block_b, B8)
    Bp = _round_up(B, tb)
    grid_b = Bp // tb

    # Pad / cast inputs. `a` is placed at lanes [400, 400+act_size) of a 512-wide tile.
    xb = jnp.zeros((Bp, OBS_P), jnp.bfloat16)
    xb = xb.at[:B, :obs_size].set(x.astype(jnp.bfloat16))
    ab = jnp.zeros((Bp, H1_PAD), jnp.bfloat16)
    ab = ab.at[:B, H1_RAW:H1_RAW + act_size].set(a.astype(jnp.bfloat16))

    flops = 2 * Bp * (OBS_P * H1_PAD + H1_PAD * H2_PAD + H2_PAD * OUT_P)
    bytes_accessed = (
        xb.size * 2 + ab.size * 2 + Bp * OUT_P * 4
        + w1p.size * 2 + w2p.size * 2 + w3p.size * 2
        + b1p.size * 4 + b2p.size * 4 + b3p.size * 4)

    out = pl.pallas_call(
        _critic_kernel,
        out_shape=jax.ShapeDtypeStruct((Bp, OUT_P), jnp.float32),
        grid=(grid_b,),
        in_specs=[
            pl.BlockSpec((tb, OBS_P), lambda i: (i, 0)),        # x tile
            pl.BlockSpec((tb, H1_PAD), lambda i: (i, 0)),       # placed action tile
            pl.BlockSpec((OBS_P, H1_PAD), lambda i: (0, 0)),    # W1 (resident)
            pl.BlockSpec((1, H1_PAD), lambda i: (0, 0)),        # b1
            pl.BlockSpec((H1_PAD, H2_PAD), lambda i: (0, 0)),   # combined W2 (resident)
            pl.BlockSpec((1, H2_PAD), lambda i: (0, 0)),        # b2
            pl.BlockSpec((H2_PAD, OUT_P), lambda i: (0, 0)),    # W3 (resident)
            pl.BlockSpec((1, OUT_P), lambda i: (0, 0)),         # b3
        ],
        out_specs=pl.BlockSpec((tb, OUT_P), lambda i: (i, 0)),
        compiler_params=pltpu.CompilerParams(
            dimension_semantics=("parallel",)),
        cost_estimate=pl.CostEstimate(
            flops=flops, transcendentals=0, bytes_accessed=bytes_accessed),
    )(xb, ab, w1p, b1p, w2p, b2p, w3p, b3p)

    return out[:B, :n_atoms]


def init_params(key, obs_size, act_size, n_atoms):
    """Canonical f32 params; weights stored (in_features, out_features)."""
    ks = jax.random.split(key, 6)

    def lin(kw, kb, fan_in, fan_out):
        bound = 1.0 / jnp.sqrt(fan_in)
        w = jax.random.uniform(kw, (fan_in, fan_out), jnp.float32, -bound, bound)
        b = jax.random.uniform(kb, (1, fan_out), jnp.float32, -bound, bound)
        return w, b

    w1, b1 = lin(ks[0], ks[1], obs_size, H1_RAW)
    w2, b2 = lin(ks[2], ks[3], H1_RAW + act_size, H2_RAW)
    w3, b3 = lin(ks[4], ks[5], H2_RAW, n_atoms)
    return {"w1": w1, "b1": b1, "w2": w2, "b2": b2, "w3": w3, "b3": b3}


def prepare_params(params, obs_size, act_size, n_atoms):
    """Zero-pad to lane-dense shapes and cast weights to bf16 (biases stay f32)."""
    assert H1_RAW + act_size <= H1_PAD, "act_size too large for the folded layout"
    OBS_P = _round_up(obs_size, 128)
    OUT_P = _round_up(n_atoms, 128)
    bf = jnp.bfloat16

    w1p = jnp.zeros((OBS_P, H1_PAD), bf).at[:obs_size, :H1_RAW].set(
        params["w1"].astype(bf))
    b1p = jnp.zeros((1, H1_PAD), jnp.float32).at[:, :H1_RAW].set(params["b1"])

    # Combined W2: rows [0,400) = obs part, rows [400,400+act_size) = action part.
    w2p = jnp.zeros((H1_PAD, H2_PAD), bf)
    w2p = w2p.at[:H1_RAW, :H2_RAW].set(params["w2"][:H1_RAW].astype(bf))
    w2p = w2p.at[H1_RAW:H1_RAW + act_size, :H2_RAW].set(
        params["w2"][H1_RAW:].astype(bf))
    b2p = jnp.zeros((1, H2_PAD), jnp.float32).at[:, :H2_RAW].set(params["b2"])

    w3p = jnp.zeros((H2_PAD, OUT_P), bf).at[:H2_RAW, :n_atoms].set(
        params["w3"].astype(bf))
    b3p = jnp.zeros((1, OUT_P), jnp.float32).at[:, :n_atoms].set(params["b3"])

    return {"w1": w1p, "b1": b1p, "w2": w2p, "b2": b2p, "w3": w3p, "b3": b3p}


def reference_forward(x, a, params):
    """Pure-f32 JAX reference mirroring the PyTorch module exactly."""
    obs = jax.nn.relu(x @ params["w1"] + params["b1"])
    h = jax.nn.relu(jnp.concatenate([obs, a], axis=1) @ params["w2"] + params["b2"])
    return h @ params["w3"] + params["b3"]


def reference_forward_bf16(x, a, params):
    """Mirrors the kernel's bf16-input / f32-accumulate arithmetic."""
    bf = jnp.bfloat16
    w1, w2, w3 = (params[k].astype(bf) for k in ("w1", "w2", "w3"))
    obs = jax.nn.relu(
        jnp.dot(x.astype(bf), w1, preferred_element_type=jnp.float32) + params["b1"])
    h1 = jnp.concatenate(
        [obs, a.astype(bf).astype(jnp.float32)], axis=1).astype(bf)
    h2 = jax.nn.relu(
        jnp.dot(h1, w2, preferred_element_type=jnp.float32) + params["b2"])
    return (jnp.dot(h2.astype(bf), w3, preferred_element_type=jnp.float32)
            + params["b3"])


if __name__ == "__main__":
    # Small shapes consistent with the module's forward.
    B, OBS, ACT, N_ATOMS = 2, 32, 8, 51
    V_MIN, V_MAX = -10.0, 10.0

    key = jax.random.PRNGKey(0)
    kx, ka, kp = jax.random.split(key, 3)
    x = jax.random.normal(kx, (B, OBS), jnp.float32)
    a = jax.random.normal(ka, (B, ACT), jnp.float32)

    params = init_params(kp, OBS, ACT, N_ATOMS)
    params_p = prepare_params(params, OBS, ACT, N_ATOMS)

    # supports buffer (plain JAX; used by distr_to_q, not by forward()).
    supports = jnp.linspace(V_MIN, V_MAX, N_ATOMS)  # noqa: F841

    out = d4pg_critic_forward(x, a, params_p, n_atoms=N_ATOMS)
    out = jax.block_until_ready(out)

    assert out.shape == (B, N_ATOMS)
    ref_bf16 = reference_forward_bf16(x, a, params)
    ref_f32 = reference_forward(x, a, params)
    assert jnp.allclose(out, ref_bf16, atol=2e-2, rtol=2e-2), \
        "mismatch vs bf16-mirrored reference"
    assert jnp.allclose(out, ref_f32, atol=2e-1, rtol=2e-1), \
        "mismatch vs f32 reference"

    print("KERNEL_OK")
</pallas_src>

<mosaic_0001>
module attributes {stable_mosaic.version = 11 : i64} {
  func.func @_critic_kernel(%arg0: i32, %arg1: memref<8x128xbf16, #tpu.memory_space<vmem>>, %arg2: memref<8x512xbf16, #tpu.memory_space<vmem>>, %arg3: memref<128x512xbf16, #tpu.memory_space<vmem>>, %arg4: memref<1x512xf32, #tpu.memory_space<vmem>>, %arg5: memref<512x384xbf16, #tpu.memory_space<vmem>>, %arg6: memref<1x384xf32, #tpu.memory_space<vmem>>, %arg7: memref<384x128xbf16, #tpu.memory_space<vmem>>, %arg8: memref<1x128xf32, #tpu.memory_space<vmem>>, %arg9: memref<8x128xf32, #tpu.memory_space<vmem>>) attributes {dimension_semantics = [#tpu.dimension_semantics<parallel>], iteration_bounds = array<i64: 1>, scalar_prefetch = 0 : i64, scratch_operands = 0 : i64, tpu.core_type = #tpu.core_type<tc>, window_params = [{transform_indices = @transform_0, window_bounds = array<i64: 8, 128>}, {transform_indices = @transform_1, window_bounds = array<i64: 8, 512>}, {pipeline_mode = #tpu.pipeline_mode<synchronous>, transform_indices = @transform_2, window_bounds = array<i64: 128, 512>}, {pipeline_mode = #tpu.pipeline_mode<synchronous>, transform_indices = @transform_3, window_bounds = array<i64: 1, 512>}, {pipeline_mode = #tpu.pipeline_mode<synchronous>, transform_indices = @transform_4, window_bounds = array<i64: 512, 384>}, {pipeline_mode = #tpu.pipeline_mode<synchronous>, transform_indices = @transform_5, window_bounds = array<i64: 1, 384>}, {pipeline_mode = #tpu.pipeline_mode<synchronous>, transform_indices = @transform_6, window_bounds = array<i64: 384, 128>}, {pipeline_mode = #tpu.pipeline_mode<synchronous>, transform_indices = @transform_7, window_bounds = array<i64: 1, 128>}, {transform_indices = @transform_8, window_bounds = array<i64: 8, 128>}]} {
    %c0 = arith.constant 0 : index
    %c0_0 = arith.constant 0 : index
    %0 = vector.load %arg1[%c0, %c0_0] : memref<8x128xbf16, #tpu.memory_space<vmem>>, vector<8x128xbf16>
    %c0_1 = arith.constant 0 : index
    %c0_2 = arith.constant 0 : index
    %1 = vector.load %arg3[%c0_1, %c0_2] : memref<128x512xbf16, #tpu.memory_space<vmem>>, vector<128x512xbf16>
    %cst = arith.constant dense<0.000000e+00> : vector<8x512xf32>
    %2 = tpu.matmul %0, %1, %cst {dimension_numbers = #tpu.dot_dimension_numbers<[1], [0], [0], [1], [0, 0, 1, 1], [], []>} : vector<8x128xbf16>, vector<128x512xbf16>, vector<8x512xf32> -> vector<8x512xf32>
    %c0_3 = arith.constant 0 : index
    %c0_4 = arith.constant 0 : index
    %3 = vector.load %arg4[%c0_3, %c0_4] : memref<1x512xf32, #tpu.memory_space<vmem>>, vector<1x512xf32>
    %4 = vector.broadcast %3 : vector<1x512xf32> to vector<8x512xf32>
    %5 = arith.addf %2, %4 : vector<8x512xf32>
    %cst_5 = arith.constant 0.000000e+00 : f32
    %6 = vector.broadcast %cst_5 : f32 to vector<8x512xf32>
    %7 = arith.maximumf %5, %6 : vector<8x512xf32>
    %c0_6 = arith.constant 0 : index
    %c0_7 = arith.constant 0 : index
    %8 = vector.load %arg2[%c0_6, %c0_7] : memref<8x512xbf16, #tpu.memory_space<vmem>>, vector<8x512xbf16>
    %9 = arith.extf %8 : vector<8x512xbf16> to vector<8x512xf32>
    %10 = arith.addf %7, %9 : vector<8x512xf32>
    %11 = arith.truncf %10 : vector<8x512xf32> to vector<8x512xbf16>
    %c0_8 = arith.constant 0 : index
    %c0_9 = arith.constant 0 : index
    %12 = vector.load %arg5[%c0_8, %c0_9] : memref<512x384xbf16, #tpu.memory_space<vmem>>, vector<512x384xbf16>
    %cst_10 = arith.constant dense<0.000000e+00> : vector<8x384xf32>
    %13 = tpu.matmul %11, %12, %cst_10 {dimension_numbers = #tpu.dot_dimension_numbers<[1], [0], [0], [1], [0, 0, 1, 1], [], []>} : vector<8x512xbf16>, vector<512x384xbf16>, vector<8x384xf32> -> vector<8x384xf32>
    %c0_11 = arith.constant 0 : index
    %c0_12 = arith.constant 0 : index
    %14 = vector.load %arg6[%c0_11, %c0_12] : memref<1x384xf32, #tpu.memory_space<vmem>>, vector<1x384xf32>
    %15 = vector.broadcast %14 : vector<1x384xf32> to vector<8x384xf32>
    %16 = arith.addf %13, %15 : vector<8x384xf32>
    %cst_13 = arith.constant 0.000000e+00 : f32
    %17 = vector.broadcast %cst_13 : f32 to vector<8x384xf32>
    %18 = arith.maximumf %16, %17 : vector<8x384xf32>
    %19 = arith.truncf %18 : vector<8x384xf32> to vector<8x384xbf16>
    %c0_14 = arith.constant 0 : index
    %c0_15 = arith.constant 0 : index
    %20 = vector.load %arg7[%c0_14, %c0_15] : memref<384x128xbf16, #tpu.memory_space<vmem>>, vector<384x128xbf16>
    %cst_16 = arith.constant dense<0.000000e+00> : vector<8x128xf32>
    %21 = tpu.matmul %19, %20, %cst_16 {dimension_numbers = #tpu.dot_dimension_numbers<[1], [0], [0], [1], [0, 0, 1, 1], [], []>} : vector<8x384xbf16>, vector<384x128xbf16>, vector<8x128xf32> -> vector<8x128xf32>
    %c0_17 = arith.constant 0 : index
    %c0_18 = arith.constant 0 : index
    %22 = vector.load %arg8[%c0_17, %c0_18] : memref<1x128xf32, #tpu.memory_space<vmem>>, vector<1x128xf32>
    %23 = vector.broadcast %22 : vector<1x128xf32> to vector<8x128xf32>
    %24 = arith.addf %21, %23 : vector<8x128xf32>
    %c0_19 = arith.constant 0 : index
    %c0_20 = arith.constant 0 : index
    %25 = vector.load %arg9[%c0_19, %c0_20] : memref<8x128xf32, #tpu.memory_space<vmem>>, vector<8x128xf32>
    tpu.vector_store %arg9[%c0_19, %c0_20], %24 {strides = array<i32>} : memref<8x128xf32, #tpu.memory_space<vmem>>, vector<8x128xf32>,
    return
  }
  func.func @transform_0(%arg0: i32) -> (i32, i32) {
    %c0_i32 = arith.constant 0 : i32
    %c0_i32_0 = arith.constant 0 : i32
    return %arg0, %c0_i32 : i32, i32
  }
  func.func @transform_1(%arg0: i32) -> (i32, i32) {
    %c0_i32 = arith.constant 0 : i32
    %c0_i32_0 = arith.constant 0 : i32
    return %arg0, %c0_i32 : i32, i32
  }
  func.func @transform_2(%arg0: i32) -> (i32, i32) {
    %c0_i32 = arith.constant 0 : i32
    %c0_i32_0 = arith.constant 0 : i32
    %c0_i32_1 = arith.constant 0 : i32
    return %c0_i32, %c0_i32_0 : i32, i32
  }
  func.func @transform_3(%arg0: i32) -> (i32, i32) {
    %c0_i32 = arith.constant 0 : i32
    %c0_i32_0 = arith.constant 0 : i32
    %c0_i32_1 = arith.constant 0 : i32
    return %c0_i32, %c0_i32_0 : i32, i32
  }
  func.func @transform_4(%arg0: i32) -> (i32, i32) {
    %c0_i32 = arith.constant 0 : i32
    %c0_i32_0 = arith.constant 0 : i32
    %c0_i32_1 = arith.constant 0 : i32
    return %c0_i32, %c0_i32_0 : i32, i32
  }
  func.func @transform_5(%arg0: i32) -> (i32, i32) {
    %c0_i32 = arith.constant 0 : i32
    %c0_i32_0 = arith.constant 0 : i32
    %c0_i32_1 = arith.constant 0 : i32
    return %c0_i32, %c0_i32_0 : i32, i32
  }
  func.func @transform_6(%arg0: i32) -> (i32, i32) {
    %c0_i32 = arith.constant 0 : i32
    %c0_i32_0 = arith.constant 0 : i32
    %c0_i32_1 = arith.constant 0 : i32
    return %c0_i32, %c0_i32_0 : i32, i32
  }
  func.func @transform_7(%arg0: i32) -> (i32, i32) {
    %c0_i32 = arith.constant 0 : i32
    %c0_i32_0 = arith.constant 0 : i32
    %c0_i32_1 = arith.constant 0 : i32
    return %c0_i32, %c0_i32_0 : i32, i32
  }
  func.func @transform_8(%arg0: i32) -> (i32, i32) {
    %c0_i32 = arith.constant 0 : i32
    %c0_i32_0 = arith.constant 0 : i32
    return %arg0, %c0_i32 : i32, i32
  }
}

</mosaic_0001>

<bundles_post_ra>
// kernel: d4pg_critic_forward.1
= control target key start
LH: loop header
LB: loop body
LE: loop exit
PB: predicated region body
PF: predicated region fallthrough
CT: control target
= control target key end

     0   :  { %13 = vsyncpa [#allocation3], 0  ;;  %s2134_s0 = inlined_call_operand.vmem [shape: bf16[8,128], index: 0, kind: input, shape index: {}]   ;;  %s2135_s1 = inlined_call_operand.vmem [shape: bf16[8,512], index: 1, kind: input, shape index: {}]   ;;  %s2136_s2 = inlined_call_operand.hbm [shape: bf16[128,512], index: 2, kind: input, shape index: {}]   ;;  %s2137_s3 = inlined_call_operand.vmem [shape: f32[1,512], index: 3, kind: input, shape index: {}]   ;;  %s2138_s4 = inlined_call_operand.hbm [shape: bf16[512,384], index: 4, kind: input, shape index: {}]   ;;  %s2139_s5 = inlined_call_operand.vmem [shape: f32[1,384], index: 5, kind: input, shape index: {}]   ;;  %s2140_s6 = inlined_call_operand.hbm [shape: bf16[384,128], index: 6, kind: input, shape index: {}]   ;;  %s2141_s7 = inlined_call_operand.vmem [shape: f32[1,128], index: 7, kind: input, shape index: {}]   ;;  %s2142_s8 = inlined_call_operand.vmem [shape: f32[8,128], index: 8, kind: output, shape index: {}]  }
   0x1   :  { %14 = vsyncpa [#allocation5], 0  ;;  %s2021_s27 = smov [#allocation4]  }
   0x2   :  { %s38_s28 = sshll.u32 %s2021_s27, 4  ;;  %s39_s28 = int_to_ptr.vmem [resolvable:$true] %s38_s28 }
   0x3   :  { %s1965_s29 = scalar_lea.vmem %s39_s28, 12288  ;;  %p1970_p1 = scmp.lt.s32.totalorder %s39_s28, %s39_s28 }
   0x4   :  { %p1966_p0 = scmp.ne.s32.totalorder %s39_s28, %s1965_s29  ;;  %p1971_p2 = scmp.lt.s32.totalorder %s1965_s29, %s1965_s29 }
   0x6   :  { %p1972_p3 = por %p1971_p2, %p1970_p1 }
   0x8   :  { %p1973_p4 = pnand %p1972_p3, %p1966_p0 }
   0xa   :  { %1976 = shalt.err (!%p1973_p4)
}
   0xb   :  { %s2022_s30 = smov 192   ;;  %s2023_s9 = smov 12  }
   0xc   :  { %44 = dma.hbm_to_vmem [thread:$0]  %s2138_s4, 12288, %s39_s28, [#allocation5], %s2022_s30, %s2022_s30, %s2023_s9  }
   0xd   :  { %s2024_s12 = smov [#allocation2]  }
   0xe   :  { %s24_s13 = sshll.u32 %s2024_s12, 4  ;;  %s25_s13 = int_to_ptr.vmem [resolvable:$true] %s24_s13 }
   0xf   :  { %s1985_s14 = scalar_lea.vmem %s25_s13, 4096  ;;  %p1990_p6 = scmp.lt.s32.totalorder %s25_s13, %s25_s13 }
  0x10   :  { %p1986_p5 = scmp.ne.s32.totalorder %s25_s13, %s1985_s14  ;;  %p1991_p7 = scmp.lt.s32.totalorder %s1985_s14, %s1985_s14 }
  0x12   :  { %p1992_p8 = por %p1991_p7, %p1990_p6 }
  0x14   :  { %p1993_p9 = pnand %p1992_p8, %p1986_p5 }
  0x16   :  { %1996 = shalt.err (!%p1993_p9)
}
  0x17   :  { %s2025_s15 = smov 256   ;;  %s2026_s16 = smov 16  }
  0x18   :  { %30 = dma.hbm_to_vmem [thread:$0]  %s2136_s2, 4096, %s25_s13, [#allocation3], %s2025_s15, %s2025_s15, %s2026_s16  }
  0x19   :  { %s2027_s19 = smov [#allocation6]  }
  0x1a   :  { %s52_s20 = sshll.u32 %s2027_s19, 4  ;;  %s53_s20 = int_to_ptr.vmem [resolvable:$true] %s52_s20 }
  0x1b   :  { %s2005_s4 = scalar_lea.vmem %s53_s20, 3072  ;;  %p2010_p11 = scmp.lt.s32.totalorder %s53_s20, %s53_s20 }
  0x1c   :  { %p2006_p10 = scmp.ne.s32.totalorder %s53_s20, %s2005_s4  ;;  %p2011_p12 = scmp.lt.s32.totalorder %s2005_s4, %s2005_s4 }
  0x1e   :  { %p2012_p13 = por %p2011_p12, %p2010_p11 }
  0x20   :  { %p2013_p0 = pnand %p2012_p13, %p2006_p10 }
  0x22   :  { %2016 = shalt.err (!%p2013_p0)
}
  0x23   :  { %s2028_s21 = smov 64   ;;  %s2029_s22 = smov 4  }
  0x24   :  { %58 = dma.hbm_to_vmem [thread:$0]  %s2140_s6, 3072, %s53_s20, [#allocation5], %s2028_s21, %s2028_s21, %s2029_s22  }
  0x25   :  { %2017 = dma.done.wait [#allocation3], 4096  }
  0x26   :  { %2018 = vsyncadd [#allocation3], 4294963200 }
  0x27   :  { %2019 = dma.done.wait [#allocation5], 15360  }
  0x28   :  { %2020 = vsyncadd [#allocation5], 4294951936  ;;  %v2030_v0 = vmov 0   ;;  %v1757_v1 = vld [vmem:[#allocation2 + $0xe4] ss:$16 sps:$4 sm:$0xff]   ;;  %vm2032_vm0 = vmmov 0  }
  0x29   :  { %318 = vmatprep.mubr.bf16.mxu0 %v2030_v0  ;;  %359 = vmatprep.mubr.bf16.mxu1 %v2030_v0  ;;  %v1759_v2 = vld [vmem:[#allocation2 + $0xec] ss:$16 sps:$4 sm:$0xff]   ;;  %v1761_v3 = vld [vmem:[#allocation2 + $0xe0] ss:$16 sps:$4 sm:$0xff]   ;;  %v1762_v4 = vld [vmem:[#allocation2 + $0xe8] ss:$16 sps:$4 sm:$0xff]  }
  0x2a   :  { %286 = vmatprep.subr.bf16.mxu0 %v1757_v1  ;;  %327 = vmatprep.subr.bf16.mxu1 %v1759_v2  ;;  %v1763_v5 = vld [vmem:[#allocation2 + $0xc4] ss:$16 sps:$4 sm:$0xff]   ;;  %v1765_v6 = vld [vmem:[#allocation2 + $0xcc] ss:$16 sps:$4 sm:$0xff]   ;;  %v1767_v7 = vld [vmem:[#allocation2 + $0xc0] ss:$16 sps:$4 sm:$0xff]  }
  0x2b   :  { %287 = vmatpush1.bf16.msra.mxu0 %v1761_v3  ;;  %328 = vmatpush1.bf16.msra.mxu1 %v1762_v4  ;;  %v1768_v8 = vld [vmem:[#allocation2 + $0xc8] ss:$16 sps:$4 sm:$0xff]   ;;  %v1769_v9 = vld [vmem:[#allocation2 + $0xa4] ss:$16 sps:$4 sm:$0xff]   ;;  %v1771_v10 = vld [vmem:[#allocation2 + $0xac] ss:$16 sps:$4 sm:$0xff]  }
  0x2c   :  { %288 = vmatprep.subr.bf16.mxu0 %v1763_v5  ;;  %329 = vmatprep.subr.bf16.mxu1 %v1765_v6  ;;  %v1773_v11 = vld [vmem:[#allocation2 + $0xa0] ss:$16 sps:$4 sm:$0xff]   ;;  %v1774_v12 = vld [vmem:[#allocation2 + $0xa8] ss:$16 sps:$4 sm:$0xff]   ;;  %v1775_v13 = vld [vmem:[#allocation2 + $0x84] ss:$16 sps:$4 sm:$0xff]  }
  0x2d   :  { %v1777_v14 = vld [vmem:[#allocation2 + $0x8c] ss:$16 sps:$4 sm:$0xff]   ;;  %v1779_v15 = vld [vmem:[#allocation2 + $0x80] ss:$16 sps:$4 sm:$0xff]   ;;  %v1780_v16 = vld [vmem:[#allocation2 + $0x88] ss:$16 sps:$4 sm:$0xff]  }
  0x2e   :  { %v1781_v17 = vld [vmem:[#allocation2 + $0x64] ss:$16 sps:$4 sm:$0xff]   ;;  %v1783_v18 = vld [vmem:[#allocation2 + $0x6c] ss:$16 sps:$4 sm:$0xff]   ;;  %v1785_v19 = vld [vmem:[#allocation2 + $0x60] ss:$16 sps:$4 sm:$0xff]  }
  0x2f   :  { %289 = vmatpush1.bf16.msra.mxu0 %v1767_v7  ;;  %330 = vmatpush1.bf16.msra.mxu1 %v1768_v8  ;;  %v1786_v20 = vld [vmem:[#allocation2 + $0x68] ss:$16 sps:$4 sm:$0xff]   ;;  %v1787_v21 = vld [vmem:[#allocation2 + $0x44] ss:$16 sps:$4 sm:$0xff]   ;;  %v1789_v22 = vld [vmem:[#allocation2 + $0x4c] ss:$16 sps:$4 sm:$0xff]  }
  0x30   :  { %290 = vmatprep.subr.bf16.mxu0 %v1769_v9  ;;  %331 = vmatprep.subr.bf16.mxu1 %v1771_v10  ;;  %v1791_v23 = vld [vmem:[#allocation2 + $0x40] ss:$16 sps:$4 sm:$0xff]   ;;  %v1792_v24 = vld [vmem:[#allocation2 + $0x48] ss:$16 sps:$4 sm:$0xff]   ;;  %v1793_v25 = vld [vmem:[#allocation2 + $0x24] ss:$16 sps:$4 sm:$0xff]  }
  0x31   :  { %v1795_v26 = vld [vmem:[#allocation2 + $0x2c] ss:$16 sps:$4 sm:$0xff]   ;;  %v1797_v27 = vld [vmem:[#allocation2 + $0x20] ss:$16 sps:$4 sm:$0xff]   ;;  %v1798_v28 = vld [vmem:[#allocation2 + $0x28] ss:$16 sps:$4 sm:$0xff]  }
  0x32   :  { %v1799_v29 = vld [vmem:[#allocation2 + $0x4] ss:$16 sps:$4 sm:$0xff]   ;;  %v1801_v30 = vld [vmem:[#allocation2 + $0xc] ss:$16 sps:$4 sm:$0xff]   ;;  %v1803_v31 = vld [vmem:[#allocation2] ss:$16 sps:$4 sm:$0xff]  }
  0x33   :  { %291 = vmatpush1.bf16.msra.mxu0 %v1773_v11  ;;  %332 = vmatpush1.bf16.msra.mxu1 %v1774_v12  ;;  %v1804_v32 = vld [vmem:[#allocation2 + $0x8] ss:$16 sps:$4 sm:$0xff]   ;;  %v71_v35 = vld [vmem:[%s2134_s0] sm:$0xf]  ;;  %v1811_v40 = vld [vmem:[#allocation4 + $0x90] ss:$12 sps:$4 sm:$0xff]  }
  0x34   :  { %292 = vmatprep.subr.bf16.mxu0 %v1775_v13  ;;  %333 = vmatprep.subr.bf16.mxu1 %v1777_v14  ;;  %v1807_v33 = vld [vmem:[#allocation4 + $0xac] ss:$12 sps:$4 sm:$0xff]   ;;  %v1805_v36 = vld [vmem:[#allocation4 + $0xa8] ss:$12 sps:$4 sm:$0xff]   ;;  %v1814_v41 = vld [vmem:[#allocation4 + $0x210] ss:$12 sps:$4 sm:$0xff]  }
  0x35   :  { %v1810_v34 = vld [vmem:[#allocation4 + $0x22c] ss:$12 sps:$4 sm:$0xff]   ;;  %v1808_v37 = vld [vmem:[#allocation4 + $0x228] ss:$12 sps:$4 sm:$0xff]   ;;  %v1825_v46 = vld [vmem:[#allocation4 + $0x64] ss:$12 sps:$4 sm:$0xff]  }
  0x36   :  { %v1813_v38 = vld [vmem:[#allocation4 + $0x94] ss:$12 sps:$4 sm:$0xff]   ;;  %v1819_v42 = vld [vmem:[#allocation4 + $0x7c] ss:$12 sps:$4 sm:$0xff]   ;;  %v1817_v44 = vld [vmem:[#allocation4 + $0x78] ss:$12 sps:$4 sm:$0xff]  }
  0x37   :  { %293 = vmatpush1.bf16.msra.mxu0 %v1779_v15  ;;  %334 = vmatpush1.bf16.msra.mxu1 %v1780_v16  ;;  %v1816_v39 = vld [vmem:[#allocation4 + $0x214] ss:$12 sps:$4 sm:$0xff]   ;;  %v1822_v43 = vld [vmem:[#allocation4 + $0x1fc] ss:$12 sps:$4 sm:$0xff]   ;;  %v1820_v45 = vld [vmem:[#allocation4 + $0x1f8] ss:$12 sps:$4 sm:$0xff]  }
  0x38   :  { %294 = vmatprep.subr.bf16.mxu0 %v1781_v17  ;;  %335 = vmatprep.subr.bf16.mxu1 %v1783_v18  ;;  %v1828_v47 = vld [vmem:[#allocation4 + $0x1e4] ss:$12 sps:$4 sm:$0xff]   ;;  %v1823_v48 = vld [vmem:[#allocation4 + $0x60] ss:$12 sps:$4 sm:$0xff]   ;;  %v1829_v52 = vld [vmem:[#allocation4 + $0x48] ss:$12 sps:$4 sm:$0xff]  }
  0x39   :  { %v1826_v49 = vld [vmem:[#allocation4 + $0x1e0] ss:$12 sps:$4 sm:$0xff]   ;;  %v1832_v53 = vld [vmem:[#allocation4 + $0x1c8] ss:$12 sps:$4 sm:$0xff]   ;;  %v1835_v56 = vld [vmem:[#allocation4 + $0x30] ss:$12 sps:$4 sm:$0xff]  }
  0x3a   :  { %v1831_v50 = vld [vmem:[#allocation4 + $0x4c] ss:$12 sps:$4 sm:$0xff]   ;;  %v1837_v54 = vld [vmem:[#allocation4 + $0x34] ss:$12 sps:$4 sm:$0xff]   ;;  %v1838_v57 = vld [vmem:[#allocation4 + $0x1b0] ss:$12 sps:$4 sm:$0xff]  }
  0x3b   :  { %295 = vmatpush1.bf16.msra.mxu0 %v1785_v19  ;;  %336 = vmatpush1.bf16.msra.mxu1 %v1786_v20  ;;  %v1834_v51 = vld [vmem:[#allocation4 + $0x1cc] ss:$12 sps:$4 sm:$0xff]   ;;  %v1840_v55 = vld [vmem:[#allocation4 + $0x1b4] ss:$12 sps:$4 sm:$0xff]   ;;  %v1843_v58 = vld [vmem:[#allocation4 + $0x1c] ss:$12 sps:$4 sm:$0xff]  }
  0x3c   :  { %296 = vmatprep.subr.bf16.mxu0 %v1787_v21  ;;  %337 = vmatprep.subr.bf16.mxu1 %v1789_v22  ;;  %v1846_v59 = vld [vmem:[#allocation4 + $0x19c] ss:$12 sps:$4 sm:$0xff]   ;;  %v1841_v60 = vld [vmem:[#allocation4 + $0x18] ss:$12 sps:$4 sm:$0xff]   ;;  %v1847_v0 = vld [vmem:[#allocation4] ss:$12 sps:$4 sm:$0xff]  }
  0x3d   :  { %v1844_v61 = vld [vmem:[#allocation4 + $0x198] ss:$12 sps:$4 sm:$0xff]   ;;  %v1850_v1 = vld [vmem:[#allocation4 + $0x180] ss:$12 sps:$4 sm:$0xff]   ;;  %v1853_v4 = vld [vmem:[#allocation4 + $0x168] ss:$12 sps:$4 sm:$0xff]  }
  0x3e   :  { %v1849_v62 = vld [vmem:[#allocation4 + $0x4] ss:$12 sps:$4 sm:$0xff]   ;;  %v1855_v2 = vld [vmem:[#allocation4 + $0x16c] ss:$12 sps:$4 sm:$0xff]   ;;  %v1856_v5 = vld [vmem:[#allocation4 + $0x2e8] ss:$12 sps:$4 sm:$0xff]  }
  0x3f   :  { %297 = vmatpush1.bf16.msra.mxu0 %v1791_v23  ;;  %338 = vmatpush1.bf16.msra.mxu1 %v1792_v24  ;;  %v1852_v63 = vld [vmem:[#allocation4 + $0x184] ss:$12 sps:$4 sm:$0xff]   ;;  %v1858_v3 = vld [vmem:[#allocation4 + $0x2ec] ss:$12 sps:$4 sm:$0xff]   ;;  %v1861_v6 = vld [vmem:[#allocation4 + $0x154] ss:$12 sps:$4 sm:$0xff]  }
  0x40   :  { %298 = vmatprep.subr.bf16.mxu0 %v1793_v25  ;;  %339 = vmatprep.subr.bf16.mxu1 %v1795_v26  ;;  %v1864_v7 = vld [vmem:[#allocation4 + $0x2d4] ss:$12 sps:$4 sm:$0xff]   ;;  %v1859_v8 = vld [vmem:[#allocation4 + $0x150] ss:$12 sps:$4 sm:$0xff]   ;;  %v1865_v12 = vld [vmem:[#allocation4 + $0x138] ss:$12 sps:$4 sm:$0xff]  }
  0x41   :  { %v1862_v9 = vld [vmem:[#allocation4 + $0x2d0] ss:$12 sps:$4 sm:$0xff]   ;;  %v1868_v13 = vld [vmem:[#allocation4 + $0x2b8] ss:$12 sps:$4 sm:$0xff]   ;;  %v1871_v16 = vld [vmem:[#allocation4 + $0x120] ss:$12 sps:$4 sm:$0xff]  }
  0x42   :  { %v1867_v10 = vld [vmem:[#allocation4 + $0x13c] ss:$12 sps:$4 sm:$0xff]   ;;  %v1873_v14 = vld [vmem:[#allocation4 + $0x124] ss:$12 sps:$4 sm:$0xff]   ;;  %v1874_v17 = vld [vmem:[#allocation4 + $0x2a0] ss:$12 sps:$4 sm:$0xff]  }
  0x43   :  { %299 = vmatpush1.bf16.msra.mxu0 %v1797_v27  ;;  %340 = vmatpush1.bf16.msra.mxu1 %v1798_v28  ;;  %v1870_v11 = vld [vmem:[#allocation4 + $0x2bc] ss:$12 sps:$4 sm:$0xff]   ;;  %v1876_v15 = vld [vmem:[#allocation4 + $0x2a4] ss:$12 sps:$4 sm:$0xff]   ;;  %v1879_v18 = vld [vmem:[#allocation4 + $0x10c] ss:$12 sps:$4 sm:$0xff]  }
  0x44   :  { %300 = vmatprep.subr.bf16.mxu0 %v1799_v29  ;;  %341 = vmatprep.subr.bf16.mxu1 %v1801_v30  ;;  %v1882_v19 = vld [vmem:[#allocation4 + $0x28c] ss:$12 sps:$4 sm:$0xff]   ;;  %v1877_v20 = vld [vmem:[#allocation4 + $0x108] ss:$12 sps:$4 sm:$0xff]   ;;  %v1883_v24 = vld [vmem:[#allocation4 + $0xf0] ss:$12 sps:$4 sm:$0xff]  }
  0x45   :  { %v1880_v21 = vld [vmem:[#allocation4 + $0x288] ss:$12 sps:$4 sm:$0xff]   ;;  %v1886_v25 = vld [vmem:[#allocation4 + $0x270] ss:$12 sps:$4 sm:$0xff]   ;;  %v1889_v28 = vld [vmem:[#allocation4 + $0xd8] ss:$12 sps:$4 sm:$0xff]  }
  0x46   :  { %v1885_v22 = vld [vmem:[#allocation4 + $0xf4] ss:$12 sps:$4 sm:$0xff]   ;;  %v1891_v26 = vld [vmem:[#allocation4 + $0xdc] ss:$12 sps:$4 sm:$0xff]   ;;  %v1892_v29 = vld [vmem:[#allocation4 + $0x258] ss:$12 sps:$4 sm:$0xff]  }
  0x47   :  { %301 = vmatpush1.bf16.msra.mxu0 %v1803_v31  ;;  %342 = vmatpush1.bf16.msra.mxu1 %v1804_v32  ;;  %v1888_v23 = vld [vmem:[#allocation4 + $0x274] ss:$12 sps:$4 sm:$0xff]   ;;  %v1894_v27 = vld [vmem:[#allocation4 + $0x25c] ss:$12 sps:$4 sm:$0xff]   ;;  %v1897_v30 = vld [vmem:[#allocation4 + $0xc4] ss:$12 sps:$4 sm:$0xff]  }
  0x48   :  { %1043 = vmatprep.subr.bf16.mxu0 %v1807_v33  ;;  %1084 = vmatprep.subr.bf16.mxu1 %v1810_v34  ;;  %v1900_v31 = vld [vmem:[#allocation4 + $0x244] ss:$12 sps:$4 sm:$0xff]   ;;  %v1895_v32 = vld [vmem:[#allocation4 + $0xc0] ss:$12 sps:$4 sm:$0xff]  }
  0x49   :  { %v1898_v33 = vld [vmem:[#allocation4 + $0x240] ss:$12 sps:$4 sm:$0xff]   ;;  %v1901_v34 = vld [vmem:[#allocation4 + $0x170] ss:$12 sps:$4 sm:$0xff]  }
  0x4a   :  { %319 = vmatmul.mubr.bf16.vlgmr.msra.gmra.mxu0 %v71_v35  ;;  %360 = vmatmul.mubr.bf16.vlgmr.msra.gmra.mxu1 %v71_v35  ;;  %v1902_v35 = vld [vmem:[#allocation4 + $0x2f0] ss:$12 sps:$4 sm:$0xff]  }
  0x4b   :  { %1044 = vmatpush1.bf16.msra.mxu0 %v1805_v36  ;;  %1085 = vmatpush1.bf16.msra.mxu1 %v1808_v37  ;;  %v106_v36 = vlaneseq }
  0x4c   :  { %1045 = vmatprep.subr.bf16.mxu0 %v1813_v38  ;;  %1086 = vmatprep.subr.bf16.mxu1 %v1816_v39 }
  0x4d   :  { %v2090_v37 = vshrl.u32 %v106_v36, 7  ;;  %v1926_v36 = vld [vmem:[#allocation4 + $0x260] ss:$12 sps:$4 sm:$0xff]  }
  0x4f   :  { %1046 = vmatpush1.bf16.msra.mxu0 %v1811_v40  ;;  %1087 = vmatpush1.bf16.msra.mxu1 %v1814_v41  ;;  %v108_v38 = vsub.s32 0, %v2090_v37  ;;  %v116_v39 = vsub.s32 2, %v2090_v37  ;;  %v104_v40 = vld [vmem:[%s2137_s3] sm:$0xf]  ;;  %v112_v41 = vsub.s32 1, %v2090_v37 }
  0x50   :  { %1047 = vmatprep.subr.bf16.mxu0 %v1819_v42  ;;  %1088 = vmatprep.subr.bf16.mxu1 %v1822_v43  ;;  %v120_v42 = vsub.s32 3, %v2090_v37  ;;  %v1625_v37 = vld [vmem:[%s2141_s7] ss:$0 sm:$0xff] }
  0x51   :  { %v109_v43 = vrot.slane %v104_v40, %v108_v38 }
  0x53   :  { %1048 = vmatpush1.bf16.msra.mxu0 %v1817_v44  ;;  %1089 = vmatpush1.bf16.msra.mxu1 %v1820_v45  ;;  %v117_v44 = vrot.slane %v104_v40, %v116_v39  ;;  %v373_v45 = vld [vmem:[%s2135_s1 + $0x8] sm:$0xff] }
  0x54   :  { %1049 = vmatprep.subr.bf16.mxu0 %v1825_v46  ;;  %1090 = vmatprep.subr.bf16.mxu1 %v1828_v47  ;;  %v372_v46 = vld [vmem:[%s2135_s1] sm:$0xff]  ;;  %v113_v47 = vrot.slane %v104_v40, %v112_v41 }
  0x57   :  { %1050 = vmatpush1.bf16.msra.mxu0 %v1823_v48  ;;  %1091 = vmatpush1.bf16.msra.mxu1 %v1826_v49  ;;  %v121_v48 = vrot.slane %v104_v40, %v120_v42  ;;  %v1927_v40 = vld [vmem:[#allocation4 + $0x20] ss:$12 sps:$4 sm:$0xff]  }
  0x58   :  { %1051 = vmatprep.subr.bf16.mxu0 %v1831_v50  ;;  %1092 = vmatprep.subr.bf16.mxu1 %v1834_v51  ;;  %v1928_v42 = vld [vmem:[#allocation4 + $0x1a0] ss:$12 sps:$4 sm:$0xff]  }
  0x5b   :  { %1052 = vmatpush1.bf16.msra.mxu0 %v1829_v52  ;;  %1093 = vmatpush1.bf16.msra.mxu1 %v1832_v53  ;;  %v376_v53 = vunpack.c.l.bf16 %v373_v45 }
  0x5c   :  { %1053 = vmatprep.subr.bf16.mxu0 %v1837_v54  ;;  %1094 = vmatprep.subr.bf16.mxu1 %v1840_v55  ;;  %v374_v54 = vunpack.c.l.bf16 %v372_v46 }
  0x5f   :  { %1054 = vmatpush1.bf16.msra.mxu0 %v1835_v56  ;;  %1095 = vmatpush1.bf16.msra.mxu1 %v1838_v57  ;;  %v375_v56 = vunpack.c.h.bf16 %v372_v46  ;;  %v1932_v46 = vld [vmem:[#allocation4 + $0x188] ss:$12 sps:$4 sm:$0xff]  }
  0x60   :  { %1055 = vmatprep.subr.bf16.mxu0 %v1843_v58  ;;  %1096 = vmatprep.subr.bf16.mxu1 %v1846_v59  ;;  %v377_v58 = vunpack.c.h.bf16 %v373_v45  ;;  %v1931_v45 = vld [vmem:[#allocation4 + $0x8] ss:$12 sps:$4 sm:$0xff]  }
  0x63   :  { %1056 = vmatpush1.bf16.msra.mxu0 %v1841_v60  ;;  %1097 = vmatpush1.bf16.msra.mxu1 %v1844_v61 }
  0x64   :  { %1057 = vmatprep.subr.bf16.mxu0 %v1849_v62  ;;  %1098 = vmatprep.subr.bf16.mxu1 %v1852_v63 }
  0x67   :  { %1058 = vmatpush1.bf16.msra.mxu0 %v1847_v0  ;;  %1099 = vmatpush1.bf16.msra.mxu1 %v1850_v1 }
  0x68   :  { %1059 = vmatprep.subr.bf16.mxu0 %v1855_v2  ;;  %1100 = vmatprep.subr.bf16.mxu1 %v1858_v3 }
  0x6b   :  { %1060 = vmatpush2.bf16.msra.mxu0 %v1853_v4  ;;  %1101 = vmatpush2.bf16.msra.mxu1 %v1856_v5 }
  0x6c   :  { %1061 = vmatprep.subr.bf16.mxu0 %v1861_v6  ;;  %1102 = vmatprep.subr.bf16.mxu1 %v1864_v7 }
  0x6f   :  { %1062 = vmatpush2.bf16.msra.mxu0 %v1859_v8  ;;  %1103 = vmatpush2.bf16.msra.mxu1 %v1862_v9 }
  0x70   :  { %1063 = vmatprep.subr.bf16.mxu0 %v1867_v10  ;;  %1104 = vmatprep.subr.bf16.mxu1 %v1870_v11 }
  0x73   :  { %1064 = vmatpush2.bf16.msra.mxu0 %v1865_v12  ;;  %1105 = vmatpush2.bf16.msra.mxu1 %v1868_v13  ;;  %v1903_v12 = vld [vmem:[#allocation4 + $0xb0] ss:$12 sps:$4 sm:$0xff]  }
  0x74   :  { %1065 = vmatprep.subr.bf16.mxu0 %v1873_v14  ;;  %1106 = vmatprep.subr.bf16.mxu1 %v1876_v15  ;;  %v1904_v13 = vld [vmem:[#allocation4 + $0x230] ss:$12 sps:$4 sm:$0xff]   ;;  %v1905_v15 = vld [vmem:[#allocation4 + $0x158] ss:$12 sps:$4 sm:$0xff]  }
  0x77   :  { %1066 = vmatpush2.bf16.msra.mxu0 %v1871_v16  ;;  %1107 = vmatpush2.bf16.msra.mxu1 %v1874_v17  ;;  %v1906_v16 = vld [vmem:[#allocation4 + $0x2d8] ss:$12 sps:$4 sm:$0xff]  }
  0x78   :  { %1067 = vmatprep.subr.bf16.mxu0 %v1879_v18  ;;  %1108 = vmatprep.subr.bf16.mxu1 %v1882_v19  ;;  %v1907_v17 = vld [vmem:[#allocation4 + $0x98] ss:$12 sps:$4 sm:$0xff]   ;;  %v1909_v19 = vld [vmem:[#allocation4 + $0x140] ss:$12 sps:$4 sm:$0xff]  }
  0x79   :  { %v1908_v18 = vld [vmem:[#allocation4 + $0x218] ss:$12 sps:$4 sm:$0xff]  }
  0x7b   :  { %1068 = vmatpush2.bf16.msra.mxu0 %v1877_v20  ;;  %1109 = vmatpush2.bf16.msra.mxu1 %v1880_v21  ;;  %v1910_v20 = vld [vmem:[#allocation4 + $0x2c0] ss:$12 sps:$4 sm:$0xff]  }
  0x7c   :  { %1069 = vmatprep.subr.bf16.mxu0 %v1885_v22  ;;  %1110 = vmatprep.subr.bf16.mxu1 %v1888_v23  ;;  %v1911_v21 = vld [vmem:[#allocation4 + $0x80] ss:$12 sps:$4 sm:$0xff]   ;;  %v1913_v23 = vld [vmem:[#allocation4 + $0x128] ss:$12 sps:$4 sm:$0xff]  }
  0x7d   :  { %v1912_v22 = vld [vmem:[#allocation4 + $0x200] ss:$12 sps:$4 sm:$0xff]  }
  0x7f   :  { %1070 = vmatpush2.bf16.msra.mxu0 %v1883_v24  ;;  %1111 = vmatpush2.bf16.msra.mxu1 %v1886_v25  ;;  %v1914_v24 = vld [vmem:[#allocation4 + $0x2a8] ss:$12 sps:$4 sm:$0xff]  }
  0x80   :  { %1071 = vmatprep.subr.bf16.mxu0 %v1891_v26  ;;  %1112 = vmatprep.subr.bf16.mxu1 %v1894_v27  ;;  %v1915_v25 = vld [vmem:[#allocation4 + $0x68] ss:$12 sps:$4 sm:$0xff]   ;;  %v1917_v27 = vld [vmem:[#allocation4 + $0x110] ss:$12 sps:$4 sm:$0xff]  }
  0x81   :  { %v1916_v26 = vld [vmem:[#allocation4 + $0x1e8] ss:$12 sps:$4 sm:$0xff]  }
  0x83   :  { %1072 = vmatpush2.bf16.msra.mxu0 %v1889_v28  ;;  %1113 = vmatpush2.bf16.msra.mxu1 %v1892_v29  ;;  %v1918_v28 = vld [vmem:[#allocation4 + $0x290] ss:$12 sps:$4 sm:$0xff]  }
  0x84   :  { %1073 = vmatprep.subr.bf16.mxu0 %v1897_v30  ;;  %1114 = vmatprep.subr.bf16.mxu1 %v1900_v31  ;;  %v1919_v29 = vld [vmem:[#allocation4 + $0x50] ss:$12 sps:$4 sm:$0xff]   ;;  %v1921_v31 = vld [vmem:[#allocation4 + $0xf8] ss:$12 sps:$4 sm:$0xff]  }
  0x85   :  { %v1920_v30 = vld [vmem:[#allocation4 + $0x1d0] ss:$12 sps:$4 sm:$0xff]  }
  0x87   :  { %1074 = vmatpush2.bf16.msra.mxu0 %v1895_v32  ;;  %1115 = vmatpush2.bf16.msra.mxu1 %v1898_v33  ;;  %v1922_v32 = vld [vmem:[#allocation4 + $0x278] ss:$12 sps:$4 sm:$0xff]  }
  0x88   :  { %1650 = vmatprep.subr.bf16.mxu0 %v1901_v34  ;;  %1672 = vmatprep.subr.bf16.mxu1 %v1902_v35  ;;  %v1923_v33 = vld [vmem:[#allocation4 + $0x38] ss:$12 sps:$4 sm:$0xff]   ;;  %v1925_v35 = vld [vmem:[#allocation4 + $0xe0] ss:$12 sps:$4 sm:$0xff]  }
  0x89   :  { %v1924_v34 = vld [vmem:[#allocation4 + $0x1b8] ss:$12 sps:$4 sm:$0xff]  }
 0x10a   :  { %v320_v49 = vpop.f32.mrf.mxu0  ;;  %v361_v50 = vpop.f32.mrf.mxu1 }
 0x10b   :  { %v321_v51 = vadd.f32 %v320_v49, %v109_v43  ;;  %v362_v52 = vadd.f32 %v361_v50, %v117_v44  ;;  %v1929_v43 = vld [vmem:[#allocation4 + $0xc8] ss:$12 sps:$4 sm:$0xff]  }
 0x10c   :  { %v322_v55 = vpop.f32.mrf.mxu0  ;;  %v363_v57 = vpop.f32.mrf.mxu1  ;;  %v1930_v44 = vld [vmem:[#allocation4 + $0x248] ss:$12 sps:$4 sm:$0xff]  }
 0x10d   :  { %v368_v59 = vmax.f32 %v321_v51, 0.0  ;;  %v370_v60 = vmax.f32 %v362_v52, 0.0  ;;  %v323_v61 = vadd.f32 %v322_v55, %v113_v47  ;;  %v364_v62 = vadd.f32 %v363_v57, %v121_v48  ;;  %v1933_v47 = vld [vmem:[#allocation6 + $0x78] sm:$0xff]   ;;  %v1935_v49 = vld [vmem:[#allocation6 + $0x70] sm:$0xff]   ;;  %v1937_v51 = vld [vmem:[#allocation6 + $0x68] sm:$0xff]  }
 0x10e   :  { %v324_v63 = vpop.f32.mrf.mxu0  ;;  %v365_v0 = vpop.f32.mrf.mxu1  ;;  %v1934_v48 = vld [vmem:[#allocation6 + $0x38] sm:$0xff]   ;;  %v1936_v50 = vld [vmem:[#allocation6 + $0x30] sm:$0xff]   ;;  %v1938_v52 = vld [vmem:[#allocation6 + $0x28] sm:$0xff]  }
 0x10f   :  { %v380_v1 = vadd.f32 %v376_v53, %v370_v60  ;;  %v369_v2 = vmax.f32 %v323_v61, 0.0  ;;  %v371_v3 = vmax.f32 %v364_v62, 0.0  ;;  %v378_v4 = vadd.f32 %v374_v54, %v368_v59  ;;  %v1939_v53 = vld [vmem:[#allocation6 + $0x60] sm:$0xff]   ;;  %v1941_v55 = vld [vmem:[#allocation6 + $0x58] sm:$0xff]   ;;  %v1943_v57 = vld [vmem:[#allocation6 + $0x50] sm:$0xff]  }
 0x110   :  { %v325_v5 = vpop.f32.mrf.mxu0  ;;  %v366_v6 = vpop.f32.mrf.mxu1  ;;  %v1940_v54 = vld [vmem:[#allocation6 + $0x20] sm:$0xff]   ;;  %v1945_v59 = vld [vmem:[#allocation6 + $0x48] sm:$0xff]   ;;  %v1949_v63 = vld [vmem:[#allocation6 + $0xb8] sm:$0xff]   ;;  %v2031_v0 = vmov 0.0  }
 0x111   :  { %v379_v7 = vadd.f32 %v375_v56, %v369_v2  ;;  %v381_v8 = vadd.f32 %v377_v58, %v371_v3  ;;  %v2111_v9 = vpack.c.bf16 %v380_v1, %v380_v1  ;;  %v2113_v14 = vpack.c.bf16 %v378_v4, %v378_v4  ;;  %v1942_v56 = vld [vmem:[#allocation6 + $0x18] sm:$0xff]   ;;  %v1944_v58 = vld [vmem:[#allocation6 + $0x10] sm:$0xff]   ;;  %v1946_v60 = vld [vmem:[#allocation6 + $0x8] sm:$0xff]  }
 0x112   :  { %v1947_v61 = vld [vmem:[#allocation6 + $0x40] sm:$0xff]   ;;  %v1950_v1 = vld [vmem:[#allocation6 + $0xb0] sm:$0xff]   ;;  %v1951_v2 = vld [vmem:[#allocation6 + $0xa8] sm:$0xff]  }
 0x113   :  { %v383_v10 = vpack.c.bf16 %v379_v7, %v379_v7  ;;  %v385_v11 = vpack.c.bf16 %v381_v8, %v381_v8  ;;  %v1948_v62 = vld [vmem:[#allocation6] sm:$0xff]   ;;  %v1953_v4 = vld [vmem:[#allocation6 + $0x98] sm:$0xff]   ;;  %v1954_v5 = vld [vmem:[#allocation6 + $0x90] sm:$0xff]  }
 0x114   :  { %v1952_v3 = vld [vmem:[#allocation6 + $0xa0] sm:$0xff]   ;;  %v1955_v6 = vld [vmem:[#allocation6 + $0x88] sm:$0xff]  }
 0x115   :  { %1075 = vmatprep.mubr.bf16.mxu0 %v383_v10  ;;  %1116 = vmatprep.mubr.bf16.mxu1 %v385_v11  ;;  %v1956_v7 = vld [vmem:[#allocation6 + $0x80] sm:$0xff]  }
 0x116   :  { %1076 = vmatmul.mubr.bf16.vlgmr.msra.gmra.mxu0 %v2113_v14  ;;  %1117 = vmatmul.mubr.bf16.vlgmr.msra.gmra.mxu1 %v2111_v9  ;;  %v514_v8 = vld [vmem:[%s2139_s5] sm:$0x7] }
 0x117   :  { %1651 = vmatpush3.bf16.msra.mxu0 %v1903_v12  ;;  %1673 = vmatpush3.bf16.msra.mxu1 %v1904_v13 }
 0x118   :  { %1157 = vmatprep.mubr.bf16.mxu0 %v383_v10  ;;  %1197 = vmatprep.mubr.bf16.mxu1 %v385_v11  ;;  %v523_v10 = vrot.slane %v514_v8, %v112_v41 }
 0x119   :  { %1652 = vmatprep.subr.bf16.mxu0 %v1905_v15  ;;  %1674 = vmatprep.subr.bf16.mxu1 %v1906_v16 }
 0x11b   :  { %1653 = vmatpush3.bf16.msra.mxu0 %v1907_v17  ;;  %1675 = vmatpush3.bf16.msra.mxu1 %v1908_v18 }
 0x11c   :  { %1654 = vmatprep.subr.bf16.mxu0 %v1909_v19  ;;  %1676 = vmatprep.subr.bf16.mxu1 %v1910_v20 }
 0x11f   :  { %1655 = vmatpush3.bf16.msra.mxu0 %v1911_v21  ;;  %1677 = vmatpush3.bf16.msra.mxu1 %v1912_v22 }
 0x120   :  { %1656 = vmatprep.subr.bf16.mxu0 %v1913_v23  ;;  %1678 = vmatprep.subr.bf16.mxu1 %v1914_v24 }
 0x123   :  { %1657 = vmatpush3.bf16.msra.mxu0 %v1915_v25  ;;  %1679 = vmatpush3.bf16.msra.mxu1 %v1916_v26 }
 0x124   :  { %1658 = vmatprep.subr.bf16.mxu0 %v1917_v27  ;;  %1680 = vmatprep.subr.bf16.mxu1 %v1918_v28  ;;  %v527_v27 = vrot.slane %v514_v8, %v116_v39 }
 0x127   :  { %1659 = vmatpush3.bf16.msra.mxu0 %v1919_v29  ;;  %1681 = vmatpush3.bf16.msra.mxu1 %v1920_v30 }
 0x128   :  { %1660 = vmatprep.subr.bf16.mxu0 %v1921_v31  ;;  %1682 = vmatprep.subr.bf16.mxu1 %v1922_v32 }
 0x12b   :  { %1661 = vmatpush3.bf16.msra.mxu0 %v1923_v33  ;;  %1683 = vmatpush3.bf16.msra.mxu1 %v1924_v34 }
 0x12c   :  { %1662 = vmatprep.subr.bf16.mxu0 %v1925_v35  ;;  %1684 = vmatprep.subr.bf16.mxu1 %v1926_v36 }
 0x12f   :  { %1663 = vmatpush3.bf16.msra.mxu0 %v1927_v40  ;;  %1685 = vmatpush3.bf16.msra.mxu1 %v1928_v42 }
 0x130   :  { %1664 = vmatprep.subr.bf16.mxu0 %v1929_v43  ;;  %1686 = vmatprep.subr.bf16.mxu1 %v1930_v44 }
 0x133   :  { %1665 = vmatpush3.bf16.msra.mxu0 %v1931_v45  ;;  %1687 = vmatpush3.bf16.msra.mxu1 %v1932_v46 }
 0x134   :  { %1694 = vmatprep.subr.bf16.mxu0 %v1933_v47  ;;  %1725 = vmatprep.subr.bf16.mxu1 %v2031_v0 }
 0x136   :  { %1158 = vmatmul.mubr.bf16.vlgmr.msra.gmra.mxu0 %v2113_v14  ;;  %1198 = vmatmul.mubr.bf16.vlgmr.msra.gmra.mxu1 %v2111_v9  ;;  %v519_v9 = vrot.slane %v514_v8, %v108_v38 }
 0x137   :  { %1695 = vmatpush3.bf16.msra.mxu0 %v1934_v48  ;;  %1726 = vmatpush3.bf16.msra.mxu1 %v1949_v63 }
 0x138   :  { %1696 = vmatprep.subr.bf16.mxu0 %v1935_v49  ;;  %1727 = vmatprep.subr.bf16.mxu1 %v2031_v0 }
 0x139   :  { %1741 = vmatprep.mubr.msk.bf16.mxu1 %vm2032_vm0, %v2031_v0 }
 0x13b   :  { %1697 = vmatpush3.bf16.msra.mxu0 %v1936_v50  ;;  %1728 = vmatpush3.bf16.msra.mxu1 %v1950_v1 }
 0x13c   :  { %1698 = vmatprep.subr.bf16.mxu0 %v1937_v51  ;;  %1729 = vmatprep.subr.bf16.mxu1 %v2031_v0 }
 0x13f   :  { %1699 = vmatpush3.bf16.msra.mxu0 %v1938_v52  ;;  %1730 = vmatpush3.bf16.msra.mxu1 %v1951_v2 }
 0x140   :  { %1700 = vmatprep.subr.bf16.mxu0 %v1939_v53  ;;  %1731 = vmatprep.subr.bf16.mxu1 %v2031_v0 }
 0x143   :  { %1701 = vmatpush3.bf16.msra.mxu0 %v1940_v54  ;;  %1732 = vmatpush3.bf16.msra.mxu1 %v1952_v3 }
 0x144   :  { %1702 = vmatprep.subr.bf16.mxu0 %v1941_v55  ;;  %1733 = vmatprep.subr.bf16.mxu1 %v2031_v0 }
 0x147   :  { %1703 = vmatpush3.bf16.msra.mxu0 %v1942_v56  ;;  %1734 = vmatpush3.bf16.msra.mxu1 %v1953_v4 }
 0x148   :  { %1704 = vmatprep.subr.bf16.mxu0 %v1943_v57  ;;  %1735 = vmatprep.subr.bf16.mxu1 %v2031_v0 }
 0x14b   :  { %1705 = vmatpush3.bf16.msra.mxu0 %v1944_v58  ;;  %1736 = vmatpush3.bf16.msra.mxu1 %v1954_v5 }
 0x14c   :  { %1706 = vmatprep.subr.bf16.mxu0 %v1945_v59  ;;  %1737 = vmatprep.subr.bf16.mxu1 %v2031_v0 }
 0x14f   :  { %1707 = vmatpush3.bf16.msra.mxu0 %v1946_v60  ;;  %1738 = vmatpush3.bf16.msra.mxu1 %v1955_v6 }
 0x150   :  { %1708 = vmatprep.subr.bf16.mxu0 %v1947_v61  ;;  %1739 = vmatprep.subr.bf16.mxu1 %v2031_v0 }
 0x153   :  { %1709 = vmatpush3.bf16.msra.mxu0 %v1948_v62  ;;  %1740 = vmatpush3.bf16.msra.mxu1 %v1956_v7 }
 0x1d6   :  { %v1077_v11 = vpop.f32.mrf.mxu0  ;;  %v1118_v12 = vpop.f32.mrf.mxu1 }
 0x1d7   :  { %v1078_v13 = vadd.f32 %v1077_v11, %v519_v9 }
 0x1d8   :  { %v1079_v14 = vpop.f32.mrf.mxu0  ;;  %v1120_v15 = vpop.f32.mrf.mxu1 }
 0x1d9   :  { %v1119_v16 = vadd.f32 %v1118_v12, %v1078_v13  ;;  %v1080_v17 = vadd.f32 %v1079_v14, %v523_v10 }
 0x1da   :  { %v1081_v18 = vpop.f32.mrf.mxu0  ;;  %v1122_v19 = vpop.f32.mrf.mxu1 }
 0x1db   :  { %v1121_v20 = vadd.f32 %v1120_v15, %v1080_v17  ;;  %v1205_v21 = vmax.f32 %v1119_v16, 0.0 }
 0x1dc   :  { %v1082_v22 = vpop.f32.mrf.mxu0  ;;  %v1123_v23 = vpop.f32.mrf.mxu1 }
 0x1dd   :  { %v1206_v24 = vmax.f32 %v1121_v20, 0.0  ;;  %v1208_v26 = vpack.c.bf16 %v1205_v21, %v1205_v21 }
 0x1df   :  { %v1209_v25 = vpack.c.bf16 %v1206_v24, %v1206_v24 }
 0x1e1   :  { %1442 = vmatprep.mubr.bf16.mxu0 %v1209_v25 }
 0x1e2   :  { %1443 = vmatmul.mubr.bf16.vlgmr.msra.gmra.mxu0 %v1208_v26 }
 0x1f6   :  { %v1666_v38 = vpop.f32.mrf.mxu0  ;;  %v1688_v41 = vpop.f32.mrf.mxu1 }
 0x1f8   :  { %v1667_v28 = vpop.f32.mrf.mxu0  ;;  %v1689_v29 = vpop.f32.mrf.mxu1 }
 0x1f9   :  { %v1668_v30 = vadd.f32 %v1667_v28, %v1666_v38  ;;  %v1690_v34 = vadd.f32 %v1689_v29, %v1688_v41 }
 0x1fa   :  { %v1669_v31 = vpop.f32.mrf.mxu0  ;;  %v1691_v32 = vpop.f32.mrf.mxu1 }
 0x1fb   :  { %v1160_v33 = vadd.f32 %v1668_v30, %v527_v27 }
 0x1fc   :  { %v1670_v35 = vpop.f32.mrf.mxu0  ;;  %v1692_v36 = vpop.f32.mrf.mxu1 }
 0x1fd   :  { %v1200_v40 = vadd.f32 %v1690_v34, %v1160_v33 }
 0x1ff   :  { %v1207_v42 = vmax.f32 %v1200_v40, 0.0 }
 0x201   :  { %v1210_v43 = vpack.c.bf16 %v1207_v42, %v1207_v42 }
 0x203   :  { %1742 = vmatmul.mubr.bf16.vlgmr.msra.gmra.mxu1 %v1210_v43 }
 0x2a2   :  { %v1710_v44 = vpop.f32.mrf.mxu0 }
 0x2a4   :  { %v1711_v45 = vpop.f32.mrf.mxu0 }
 0x2a5   :  { %v1712_v48 = vadd.f32 %v1711_v45, %v1710_v44 }
 0x2a6   :  { %v1713_v46 = vpop.f32.mrf.mxu0 }
 0x2a7   :  { %v1445_v39 = vadd.f32 %v1712_v48, %v1625_v37 }
 0x2a8   :  { %v1714_v47 = vpop.f32.mrf.mxu0 }
 0x2c3   :  { %v1484_v49 = vpop.f32.mrf.mxu1 }
 0x2c4   :  { %v1485_v50 = vadd.f32 %v1484_v49, %v1445_v39 }
 0x2c5   :  { %v1743_v51 = vpop.f32.mrf.mxu1 }
 0x2c6   :  { %1490 = vst [vmem:[%s2142_s8] sm:$0xff] %v1485_v50 }
 0x2c7   :  { %v1487_v52 = vpop.f32.mrf.mxu1 }
 0x2c9   :  { %v1744_v53 = vpop.f32.mrf.mxu1 }
 0x2ca   :  { %1495 = vsyncpa [#allocation3], 1 }
 0x2cb   :  { %1496 = vsyncpa [#allocation5], 1 }

</bundles_post_ra>
